<compile_context>
chip_gen: v6e
topology: v6e:2x2x1
jax: 0.10.0
libtpu: 0.0.40
codegen_flags: <defaults>
</compile_context>

<pallas_src>
import jax
import jax.numpy as jnp
from jax.experimental import pallas as pl
from jax.experimental.pallas import tpu as pltpu


def _round_up(x, m):
    return ((x + m - 1) // m) * m


def _temporal_conv_kernel(x_ref, w_ref, b_ref, o_ref):
    # x_ref: (tm, inp) frame tile; w_ref: (inp, outp) resident weight view;
    # b_ref: (1, outp) bias.  One MXU matmul (f32 accumulation) + broadcast bias add.
    o_ref[...] = (
        jnp.dot(x_ref[...], w_ref[...], preferred_element_type=jnp.float32)
        + b_ref[...]
    ).astype(o_ref.dtype)


def temporal_convolution2(x, weight, bias, *, kw=1, dw=1, max_frame_tile=2048,
                          operand_dtype=None):
    """x: (N, inp); weight: (outp, inp*kw); bias: (outp,).  Returns (N, outp) f32."""
    N, inp = x.shape
    outp = bias.shape[0]
    assert kw == 1 and dw == 1, "module instantiates window_size=1, stride=1"
    n_out_frames = (N - kw) // dw + 1  # == N for kw=dw=1

    # Same memory reinterpretation as PyTorch `self.weight.view(self.inp, self.outp*self.kw)`
    # (reshape, NOT a transpose — do not "fix" this to weight.T).
    w_view = weight.reshape(inp, outp * kw)

    # Optional reduced-precision operand path (keeps f32 accumulation / bias / output).
    if operand_dtype is not None:
        x = x.astype(operand_dtype)
        w_view = w_view.astype(operand_dtype)
    b2 = bias.reshape(1, outp).astype(jnp.float32)

    # Frame tile:
    #   * small N -> one full-extent block (full first dim is exempt from the 8-row
    #     rule), grid=(1,), no per-step pipeline overhead.
    #   * large N -> multiples of 8 rows, >= 2 grid steps (so v7x's second TC gets
    #     work under dimension_semantics=("parallel",)), capped at max_frame_tile
    #     to stay well inside v5e's 16 MiB scoped VMEM default.
    if N <= 1024:
        tm = N
    else:
        tm = min(max_frame_tile, _round_up(pl.cdiv(N, 2), 8))
    grid = (pl.cdiv(N, tm),)  # ragged last block handled by Pallas (no row padding)

    # Honest cost hints from the true (unpadded) shapes.
    op_itemsize = jnp.dtype(x.dtype).itemsize
    flops = 2 * N * inp * outp
    bytes_accessed = op_itemsize * (x.size + w_view.size) + 4 * (b2.size + N * outp)

    out = pl.pallas_call(
        _temporal_conv_kernel,
        out_shape=jax.ShapeDtypeStruct((N, outp), jnp.float32),
        grid_spec=pltpu.PrefetchScalarGridSpec(
            num_scalar_prefetch=0,
            grid=grid,
            in_specs=[
                # Frame tile: last dim == full inp (no K padding), ragged last block OK.
                pl.BlockSpec((tm, inp), lambda i: (i, 0)),
                # Resident weight view: constant index map -> single buffer.
                pl.BlockSpec(
                    (inp, outp * kw), lambda i: (0, 0),
                    pipeline_mode=pl.Buffered(1),
                ),
                # Resident bias.
                pl.BlockSpec(
                    (1, outp), lambda i: (0, 0),
                    pipeline_mode=pl.Buffered(1),
                ),
            ],
            out_specs=pl.BlockSpec((tm, outp), lambda i: (i, 0)),
        ),
        compiler_params=pltpu.CompilerParams(
            dimension_semantics=("parallel",),
        ),
        cost_estimate=pl.CostEstimate(
            flops=flops, transcendentals=0, bytes_accessed=bytes_accessed
        ),
    )(x, w_view, b2)

    # For kw=dw=1, n_out_frames == N; keep the general slice for other configs.
    if n_out_frames != N:
        out = out[:n_out_frames]
    return out


if __name__ == "__main__":
    # Module hyper-params from the PyTorch source: cov_dim = mem_dim = 150,
    # window_size = 1, input of 158 frames.
    cov_dim = 150   # inp
    mem_dim = 150   # outp
    kw = 1
    n_frames = 158

    key = jax.random.PRNGKey(0)
    k_x, k_w, k_b = jax.random.split(key, 3)

    # Deterministic init matching reset(): uniform(-stdv, stdv), stdv = 1/sqrt(kw*inp)
    stdv = 1.0 / jnp.sqrt(jnp.float32(kw * cov_dim))
    weight = jax.random.uniform(
        k_w, (mem_dim, cov_dim * kw), jnp.float32, minval=-stdv, maxval=stdv
    )
    bias = jax.random.uniform(
        k_b, (mem_dim,), jnp.float32, minval=-stdv, maxval=stdv
    )
    x = jax.random.normal(k_x, (n_frames, cov_dim), jnp.float32)

    # Default f32 operands for exact parity with the PyTorch reference.
    # (Pass operand_dtype=jnp.bfloat16 for the faster reduced-precision path.)
    out = temporal_convolution2(x, weight, bias, kw=kw)
    out = jax.block_until_ready(out)

    # Pure-JAX reference of the same semantics (view-as-reshape, not transpose).
    ref = x @ weight.reshape(cov_dim, mem_dim * kw) + bias[None, :]
    assert out.shape == (n_frames, mem_dim)
    assert jnp.allclose(out, ref, atol=1e-5, rtol=1e-5)

    print("KERNEL_OK")
</pallas_src>

<mosaic_0001>
module attributes {stable_mosaic.version = 11 : i64} {
  func.func @_temporal_conv_kernel(%arg0: i32, %arg1: memref<158x150xf32, #tpu.memory_space<vmem>>, %arg2: memref<150x150xf32, #tpu.memory_space<vmem>>, %arg3: memref<1x150xf32, #tpu.memory_space<vmem>>, %arg4: memref<158x150xf32, #tpu.memory_space<vmem>>) attributes {dimension_semantics = [#tpu.dimension_semantics<parallel>], iteration_bounds = array<i64: 1>, scalar_prefetch = 0 : i64, scratch_operands = 0 : i64, tpu.core_type = #tpu.core_type<tc>, window_params = [{transform_indices = @transform_0, window_bounds = array<i64: 158, 150>}, {pipeline_mode = #tpu.pipeline_mode<synchronous>, transform_indices = @transform_1, window_bounds = array<i64: 150, 150>}, {pipeline_mode = #tpu.pipeline_mode<synchronous>, transform_indices = @transform_2, window_bounds = array<i64: 1, 150>}, {transform_indices = @transform_3, window_bounds = array<i64: 158, 150>}]} {
    %c0 = arith.constant 0 : index
    %c0_0 = arith.constant 0 : index
    %0 = vector.load %arg1[%c0, %c0_0] : memref<158x150xf32, #tpu.memory_space<vmem>>, vector<158x150xf32>
    %c0_1 = arith.constant 0 : index
    %c0_2 = arith.constant 0 : index
    %1 = vector.load %arg2[%c0_1, %c0_2] : memref<150x150xf32, #tpu.memory_space<vmem>>, vector<150x150xf32>
    %cst = arith.constant dense<0.000000e+00> : vector<158x150xf32>
    %2 = tpu.matmul %0, %1, %cst {dimension_numbers = #tpu.dot_dimension_numbers<[1], [0], [0], [1], [0, 0, 1, 1], [], []>} : vector<158x150xf32>, vector<150x150xf32>, vector<158x150xf32> -> vector<158x150xf32>
    %c0_3 = arith.constant 0 : index
    %c0_4 = arith.constant 0 : index
    %3 = vector.load %arg3[%c0_3, %c0_4] : memref<1x150xf32, #tpu.memory_space<vmem>>, vector<1x150xf32>
    %4 = vector.broadcast %3 : vector<1x150xf32> to vector<158x150xf32>
    %5 = arith.addf %2, %4 : vector<158x150xf32>
    %c0_5 = arith.constant 0 : index
    %c0_6 = arith.constant 0 : index
    %6 = vector.load %arg4[%c0_5, %c0_6] : memref<158x150xf32, #tpu.memory_space<vmem>>, vector<158x150xf32>
    tpu.vector_store %arg4[%c0_5, %c0_6], %5 {strides = array<i32>} : memref<158x150xf32, #tpu.memory_space<vmem>>, vector<158x150xf32>,
    return
  }
  func.func @transform_0(%arg0: i32) -> (i32, i32) {
    %c0_i32 = arith.constant 0 : i32
    %c0_i32_0 = arith.constant 0 : i32
    return %arg0, %c0_i32 : i32, i32
  }
  func.func @transform_1(%arg0: i32) -> (i32, i32) {
    %c0_i32 = arith.constant 0 : i32
    %c0_i32_0 = arith.constant 0 : i32
    %c0_i32_1 = arith.constant 0 : i32
    return %c0_i32, %c0_i32_0 : i32, i32
  }
  func.func @transform_2(%arg0: i32) -> (i32, i32) {
    %c0_i32 = arith.constant 0 : i32
    %c0_i32_0 = arith.constant 0 : i32
    %c0_i32_1 = arith.constant 0 : i32
    return %c0_i32, %c0_i32_0 : i32, i32
  }
  func.func @transform_3(%arg0: i32) -> (i32, i32) {
    %c0_i32 = arith.constant 0 : i32
    %c0_i32_0 = arith.constant 0 : i32
    return %arg0, %c0_i32 : i32, i32
  }
}

</mosaic_0001>

<bundles_post_ra>
// kernel: tpu_custom_call.1
= control target key start
LH: loop header
LB: loop body
LE: loop exit
PB: predicated region body
PF: predicated region fallthrough
CT: control target
= control target key end

     0   :  { %vm165_vm0 = vcmask 1045504   ;;  %vm104_vm1 = vcmask 179200   ;;  %vm396_vm2 = vcmask 177152   ;;  %s922_s1 = inlined_call_operand.vmem [shape: f32[150,150], index: 1, kind: input, shape index: {}]   ;;  %s923_s0 = inlined_call_operand.vmem [shape: f32[158,150], index: 0, kind: input, shape index: {}]   ;;  %s924_s2 = inlined_call_operand.vmem [shape: f32[1,150], index: 2, kind: input, shape index: {}]   ;;  %s925_s3 = inlined_call_operand.vmem [shape: f32[158,150], index: 3, kind: output, shape index: {}]  }
   0x1   :  { %v85_v0 = vld [vmem:[%s922_s1 + $0xf8] sm:$0xff]  ;;  %v84_v1 = vld [vmem:[%s922_s1 + $0xf0] sm:$0xff]  ;;  %v83_v2 = vld [vmem:[%s922_s1 + $0xe8] sm:$0xff] }
   0x2   :  { %172 = vmatprep.subr.mxu0 %v85_v0  ;;  %424 = vmatprep.subr.mxu1 %v85_v0  ;;  %v82_v3 = vld [vmem:[%s922_s1 + $0xe0] sm:$0xff]  ;;  %v81_v4 = vld [vmem:[%s922_s1 + $0xd8] sm:$0xff]  ;;  %v80_v5 = vld [vmem:[%s922_s1 + $0xd0] sm:$0xff] }
   0x3   :  { %173 = vmatpush1.msra.mxu0 %v84_v1  ;;  %443 = vmatpush1.msra.mxu1 %v84_v1  ;;  %v79_v6 = vld [vmem:[%s922_s1 + $0xc8] sm:$0xff]  ;;  %v78_v7 = vld [vmem:[%s922_s1 + $0xc0] sm:$0xff]  ;;  %v77_v8 = vld [vmem:[%s922_s1 + $0xb8] sm:$0xff] }
   0x4   :  { %174 = vmatprep.subr.mxu0 %v83_v2  ;;  %425 = vmatprep.subr.mxu1 %v83_v2  ;;  %v76_v9 = vld [vmem:[%s922_s1 + $0xb0] sm:$0xff]  ;;  %v75_v10 = vld [vmem:[%s922_s1 + $0xa8] sm:$0xff]  ;;  %v74_v11 = vld [vmem:[%s922_s1 + $0xa0] sm:$0xff] }
   0x5   :  { %175 = vmatpush1.msra.mxu0 %v82_v3  ;;  %444 = vmatpush1.msra.mxu1 %v82_v3  ;;  %v73_v12 = vld [vmem:[%s922_s1 + $0x98] sm:$0xff]  ;;  %v72_v13 = vld [vmem:[%s922_s1 + $0x90] sm:$0xff]  ;;  %v71_v14 = vld [vmem:[%s922_s1 + $0x88] sm:$0xff] }
   0x6   :  { %176 = vmatprep.subr.mxu0 %v81_v4  ;;  %426 = vmatprep.subr.mxu1 %v81_v4  ;;  %v70_v15 = vld [vmem:[%s922_s1 + $0x80] sm:$0xff]  ;;  %v69_v16 = vld [vmem:[%s922_s1 + $0x78] sm:$0xff]  ;;  %v68_v17 = vld [vmem:[%s922_s1 + $0x70] sm:$0xff] }
   0x7   :  { %177 = vmatpush1.msra.mxu0 %v80_v5  ;;  %445 = vmatpush1.msra.mxu1 %v80_v5  ;;  %v67_v18 = vld [vmem:[%s922_s1 + $0x68] sm:$0xff]  ;;  %v66_v19 = vld [vmem:[%s922_s1 + $0x60] sm:$0xff]  ;;  %v65_v20 = vld [vmem:[%s922_s1 + $0x58] sm:$0xff] }
   0x8   :  { %178 = vmatprep.subr.mxu0 %v79_v6  ;;  %427 = vmatprep.subr.mxu1 %v79_v6  ;;  %v64_v21 = vld [vmem:[%s922_s1 + $0x50] sm:$0xff]  ;;  %v63_v22 = vld [vmem:[%s922_s1 + $0x48] sm:$0xff]  ;;  %v62_v23 = vld [vmem:[%s922_s1 + $0x40] sm:$0xff] }
   0x9   :  { %179 = vmatpush1.msra.mxu0 %v78_v7  ;;  %446 = vmatpush1.msra.mxu1 %v78_v7  ;;  %v61_v24 = vld [vmem:[%s922_s1 + $0x38] sm:$0xff]  ;;  %v60_v25 = vld [vmem:[%s922_s1 + $0x30] sm:$0xff]  ;;  %v59_v26 = vld [vmem:[%s922_s1 + $0x28] sm:$0xff] }
   0xa   :  { %180 = vmatprep.subr.mxu0 %v77_v8  ;;  %428 = vmatprep.subr.mxu1 %v77_v8  ;;  %v58_v27 = vld [vmem:[%s922_s1 + $0x20] sm:$0xff]  ;;  %v57_v28 = vld [vmem:[%s922_s1 + $0x18] sm:$0xff]  ;;  %v56_v29 = vld [vmem:[%s922_s1 + $0x10] sm:$0xff] }
   0xb   :  { %181 = vmatpush1.msra.mxu0 %v76_v9  ;;  %447 = vmatpush1.msra.mxu1 %v76_v9  ;;  %v55_v30 = vld [vmem:[%s922_s1 + $0x8] sm:$0xff]  ;;  %v54_v31 = vld [vmem:[%s922_s1] sm:$0xff]  ;;  %v89_v34 = vld [vmem:[%s922_s1 + $0x118] sm:$0xff] }
   0xc   :  { %182 = vmatprep.subr.mxu0 %v75_v10  ;;  %429 = vmatprep.subr.mxu1 %v75_v10  ;;  %v91_v32 = vld [vmem:[%s922_s1 + $0x128] sm:$0x3f]  ;;  %v90_v33 = vld [vmem:[%s922_s1 + $0x120] sm:$0x3f]  ;;  %v88_v35 = vld [vmem:[%s922_s1 + $0x110] sm:$0xff] }
   0xd   :  { %183 = vmatpush1.msra.mxu0 %v74_v11  ;;  %448 = vmatpush1.msra.mxu1 %v74_v11  ;;  %v87_v36 = vld [vmem:[%s922_s1 + $0x108] sm:$0xff]  ;;  %v86_v37 = vld [vmem:[%s922_s1 + $0x100] sm:$0xff]  ;;  %v17_v42 = vld [vmem:[%s923_s0 + $0x18] sm:$0xff] }
   0xe   :  { %184 = vmatprep.subr.mxu0 %v73_v12  ;;  %430 = vmatprep.subr.mxu1 %v73_v12  ;;  %v15_v38 = vld [vmem:[%s923_s0 + $0x8] sm:$0xff]  ;;  %v14_v40 = vld [vmem:[%s923_s0] sm:$0xff]  ;;  %v37_v43 = vld [vmem:[%s923_s0 + $0xb8] sm:$0xff] }
   0xf   :  { %185 = vmatpush1.msra.mxu0 %v72_v13  ;;  %449 = vmatpush1.msra.mxu1 %v72_v13  ;;  %v35_v39 = vld [vmem:[%s923_s0 + $0xa8] sm:$0xff]  ;;  %v34_v41 = vld [vmem:[%s923_s0 + $0xa0] sm:$0xff]  ;;  %v16_v44 = vld [vmem:[%s923_s0 + $0x10] sm:$0xff] }
  0x10   :  { %186 = vmatprep.subr.mxu0 %v71_v14  ;;  %431 = vmatprep.subr.mxu1 %v71_v14  ;;  %v36_v45 = vld [vmem:[%s923_s0 + $0xb0] sm:$0xff]  ;;  %v19_v46 = vld [vmem:[%s923_s0 + $0x28] sm:$0xff]  ;;  %v18_v48 = vld [vmem:[%s923_s0 + $0x20] sm:$0xff]  ;;  %v94_v14 = vlaneseq }
  0x11   :  { %187 = vmatpush1.msra.mxu0 %v70_v15  ;;  %450 = vmatpush1.msra.mxu1 %v70_v15  ;;  %v39_v47 = vld [vmem:[%s923_s0 + $0xc8] sm:$0xff]  ;;  %v38_v49 = vld [vmem:[%s923_s0 + $0xc0] sm:$0xff]  ;;  %v21_v50 = vld [vmem:[%s923_s0 + $0x38] sm:$0xff] }
  0x12   :  { %188 = vmatprep.subr.mxu0 %v69_v16  ;;  %432 = vmatprep.subr.mxu1 %v69_v16  ;;  %v41_v51 = vld [vmem:[%s923_s0 + $0xd8] sm:$0xff]  ;;  %v20_v52 = vld [vmem:[%s923_s0 + $0x30] sm:$0xff]  ;;  %v23_v54 = vld [vmem:[%s923_s0 + $0x48] sm:$0xff]  ;;  %v95_v15 = vshrl.u32 %v94_v14, 7 }
  0x13   :  { %189 = vmatpush1.msra.mxu0 %v68_v17  ;;  %451 = vmatpush1.msra.mxu1 %v68_v17  ;;  %v40_v53 = vld [vmem:[%s923_s0 + $0xd0] sm:$0xff]  ;;  %v43_v55 = vld [vmem:[%s923_s0 + $0xe8] sm:$0xff]  ;;  %v22_v56 = vld [vmem:[%s923_s0 + $0x40] sm:$0xff] }
  0x14   :  { %190 = vmatprep.subr.mxu0 %v67_v18  ;;  %433 = vmatprep.subr.mxu1 %v67_v18  ;;  %v42_v57 = vld [vmem:[%s923_s0 + $0xe0] sm:$0xff]  ;;  %v25_v58 = vld [vmem:[%s923_s0 + $0x58] sm:$0xff]  ;;  %v24_v60 = vld [vmem:[%s923_s0 + $0x50] sm:$0xff]  ;;  %v96_v16 = vsub.s32 0, %v95_v15  ;;  %v100_v18 = vsub.s32 1, %v95_v15 }
  0x15   :  { %191 = vmatpush1.msra.mxu0 %v66_v19  ;;  %452 = vmatpush1.msra.mxu1 %v66_v19  ;;  %v45_v59 = vld [vmem:[%s923_s0 + $0xf8] sm:$0xff]  ;;  %v44_v61 = vld [vmem:[%s923_s0 + $0xf0] sm:$0xff]  ;;  %v27_v62 = vld [vmem:[%s923_s0 + $0x68] sm:$0xff] }
  0x16   :  { %192 = vmatprep.subr.mxu0 %v65_v20  ;;  %434 = vmatprep.subr.mxu1 %v65_v20  ;;  %v47_v63 = vld [vmem:[%s923_s0 + $0x108] sm:$0xff]  ;;  %v26_v0 = vld [vmem:[%s923_s0 + $0x60] sm:$0xff]  ;;  %v29_v2 = vld [vmem:[%s923_s0 + $0x78] sm:$0xff] }
  0x17   :  { %193 = vmatpush1.msra.mxu0 %v64_v21  ;;  %453 = vmatpush1.msra.mxu1 %v64_v21  ;;  %v46_v1 = vld [vmem:[%s923_s0 + $0x100] sm:$0xff]  ;;  %v49_v3 = vld [vmem:[%s923_s0 + $0x118] sm:$0xff]  ;;  %v28_v4 = vld [vmem:[%s923_s0 + $0x70] sm:$0xff] }
  0x18   :  { %194 = vmatprep.subr.mxu0 %v63_v22  ;;  %435 = vmatprep.subr.mxu1 %v63_v22  ;;  %v48_v5 = vld [vmem:[%s923_s0 + $0x110] sm:$0xff]  ;;  %v31_v6 = vld [vmem:[%s923_s0 + $0x88] sm:$0xff]  ;;  %v30_v8 = vld [vmem:[%s923_s0 + $0x80] sm:$0xff] }
  0x19   :  { %195 = vmatpush1.msra.mxu0 %v62_v23  ;;  %454 = vmatpush1.msra.mxu1 %v62_v23  ;;  %v51_v7 = vld [vmem:[%s923_s0 + $0x128] sm:$0xff]  ;;  %v50_v9 = vld [vmem:[%s923_s0 + $0x120] sm:$0xff]  ;;  %v33_v10 = vld [vmem:[%s923_s0 + $0x98] sm:$0xff] }
  0x1a   :  { %196 = vmatprep.subr.mxu0 %v61_v24  ;;  %436 = vmatprep.subr.mxu1 %v61_v24  ;;  %v53_v11 = vld [vmem:[%s923_s0 + $0x138] sm:$0x3f]  ;;  %v32_v12 = vld [vmem:[%s923_s0 + $0x90] sm:$0xff]  ;;  %v92_v17 = vld [vmem:[%s924_s2] sm:$0x3] }
  0x1b   :  { %197 = vmatpush1.msra.mxu0 %v60_v25  ;;  %455 = vmatpush1.msra.mxu1 %v60_v25  ;;  %v52_v13 = vld [vmem:[%s923_s0 + $0x130] sm:$0x3f]  ;;  %v739_v19 = vrot.slane %v92_v17, %v96_v16  ;;  %v741_v20 = vrot.slane %v92_v17, %v100_v18 }
  0x1c   :  { %198 = vmatprep.subr.mxu0 %v59_v26  ;;  %437 = vmatprep.subr.mxu1 %v59_v26 }
  0x1d   :  { %199 = vmatpush1.msra.mxu0 %v58_v27  ;;  %456 = vmatpush1.msra.mxu1 %v58_v27 }
  0x1e   :  { %200 = vmatprep.subr.mxu0 %v57_v28  ;;  %438 = vmatprep.subr.mxu1 %v57_v28 }
  0x1f   :  { %201 = vmatpush1.msra.mxu0 %v56_v29  ;;  %457 = vmatpush1.msra.mxu1 %v56_v29 }
  0x20   :  { %202 = vmatprep.subr.mxu0 %v55_v30  ;;  %439 = vmatprep.subr.mxu1 %v55_v30 }
  0x21   :  { %203 = vmatpush1.msra.mxu0 %v54_v31  ;;  %458 = vmatpush1.msra.mxu1 %v54_v31 }
  0x22   :  { %402 = vmatprep.subr.msk.mxu0 %vm165_vm0, %v91_v32  ;;  %440 = vmatprep.subr.msk.mxu1 %vm165_vm0, %v91_v32 }
  0x23   :  { %403 = vmatpush2.msk.msra.mxu0 %vm165_vm0, %v90_v33  ;;  %459 = vmatpush2.msk.msra.mxu1 %vm165_vm0, %v90_v33 }
  0x24   :  { %232 = vmatprep.subr.mxu0 %v89_v34  ;;  %441 = vmatprep.subr.mxu1 %v89_v34 }
  0x25   :  { %233 = vmatpush2.msra.mxu0 %v88_v35  ;;  %460 = vmatpush2.msra.mxu1 %v88_v35 }
  0x26   :  { %234 = vmatprep.subr.mxu0 %v87_v36  ;;  %442 = vmatprep.subr.mxu1 %v87_v36 }
  0x27   :  { %235 = vmatpush2.msra.mxu0 %v86_v37  ;;  %461 = vmatpush2.msra.mxu1 %v86_v37 }
  0x28   :  { %404 = vmatprep.mubr.msk.f32.mxu0 %vm104_vm1, %v15_v38  ;;  %414 = vmatprep.mubr.msk.f32.mxu1 %vm104_vm1, %v35_v39 }
  0x29   :  { %237 = vmatmul.mubr.f32.vlgmr.msra.gmra.mxu0 %v14_v40  ;;  %297 = vmatmul.mubr.f32.vlgmr.msra.gmra.mxu1 %v34_v41 }
  0x2a   :  { %405 = vmatprep.mubr.msk.f32.mxu0 %vm104_vm1, %v17_v42  ;;  %415 = vmatprep.mubr.msk.f32.mxu1 %vm104_vm1, %v37_v43 }
  0x2d   :  { %243 = vmatmul.mubr.f32.gmra.mxu0 %v16_v44  ;;  %303 = vmatmul.mubr.f32.gmra.mxu1 %v36_v45 }
  0x2e   :  { %406 = vmatprep.mubr.msk.f32.mxu0 %vm104_vm1, %v19_v46  ;;  %416 = vmatprep.mubr.msk.f32.mxu1 %vm104_vm1, %v39_v47 }
  0x31   :  { %249 = vmatmul.mubr.f32.gmra.mxu0 %v18_v48  ;;  %309 = vmatmul.mubr.f32.gmra.mxu1 %v38_v49 }
  0x32   :  { %407 = vmatprep.mubr.msk.f32.mxu0 %vm104_vm1, %v21_v50  ;;  %417 = vmatprep.mubr.msk.f32.mxu1 %vm104_vm1, %v41_v51 }
  0x35   :  { %255 = vmatmul.mubr.f32.gmra.mxu0 %v20_v52  ;;  %315 = vmatmul.mubr.f32.gmra.mxu1 %v40_v53 }
  0x36   :  { %408 = vmatprep.mubr.msk.f32.mxu0 %vm104_vm1, %v23_v54  ;;  %418 = vmatprep.mubr.msk.f32.mxu1 %vm104_vm1, %v43_v55 }
  0x39   :  { %261 = vmatmul.mubr.f32.gmra.mxu0 %v22_v56  ;;  %321 = vmatmul.mubr.f32.gmra.mxu1 %v42_v57 }
  0x3a   :  { %409 = vmatprep.mubr.msk.f32.mxu0 %vm104_vm1, %v25_v58  ;;  %419 = vmatprep.mubr.msk.f32.mxu1 %vm104_vm1, %v45_v59 }
  0x3d   :  { %267 = vmatmul.mubr.f32.gmra.mxu0 %v24_v60  ;;  %327 = vmatmul.mubr.f32.gmra.mxu1 %v44_v61 }
  0x3e   :  { %410 = vmatprep.mubr.msk.f32.mxu0 %vm104_vm1, %v27_v62  ;;  %420 = vmatprep.mubr.msk.f32.mxu1 %vm104_vm1, %v47_v63 }
  0x41   :  { %273 = vmatmul.mubr.f32.gmra.mxu0 %v26_v0  ;;  %333 = vmatmul.mubr.f32.gmra.mxu1 %v46_v1 }
  0x42   :  { %411 = vmatprep.mubr.msk.f32.mxu0 %vm104_vm1, %v29_v2  ;;  %421 = vmatprep.mubr.msk.f32.mxu1 %vm104_vm1, %v49_v3 }
  0x45   :  { %279 = vmatmul.mubr.f32.gmra.mxu0 %v28_v4  ;;  %339 = vmatmul.mubr.f32.gmra.mxu1 %v48_v5 }
  0x46   :  { %412 = vmatprep.mubr.msk.f32.mxu0 %vm104_vm1, %v31_v6  ;;  %422 = vmatprep.mubr.msk.f32.mxu1 %vm104_vm1, %v51_v7 }
  0x49   :  { %285 = vmatmul.mubr.f32.gmra.mxu0 %v30_v8  ;;  %345 = vmatmul.mubr.f32.gmra.mxu1 %v50_v9 }
  0x4a   :  { %413 = vmatprep.mubr.msk.f32.mxu0 %vm104_vm1, %v33_v10  ;;  %423 = vmatprep.mubr.msk.f32.mxu1 %vm104_vm1, %v53_v11 }
  0x4d   :  { %291 = vmatmul.mubr.f32.gmra.mxu0 %v32_v12  ;;  %351 = vmatmul.mubr.f32.gmra.mxu1 %v52_v13 }
  0xe9   :  { %v238_v21 = vpop.f32.mrf.mxu0  ;;  %v298_v22 = vpop.f32.mrf.mxu1 }
  0xea   :  { %v239_v23 = vadd.f32 %v238_v21, %v739_v19  ;;  %v299_v24 = vadd.f32 %v298_v22, %v739_v19 }
  0xeb   :  { %v240_v25 = vpop.f32.mrf.mxu0  ;;  %v300_v26 = vpop.f32.mrf.mxu1 }
  0xec   :  { %357 = vst [vmem:[%s925_s3] sm:$0xff] %v239_v23  ;;  %377 = vst [vmem:[%s925_s3 + $0xa0] sm:$0xff] %v299_v24  ;;  %v241_v27 = vadd.f32 %v240_v25, %v741_v20  ;;  %v301_v28 = vadd.f32 %v300_v26, %v741_v20 }
  0xed   :  { %v244_v29 = vpop.f32.mrf.mxu0  ;;  %v304_v30 = vpop.f32.mrf.mxu1 }
  0xee   :  { %358 = vst.msk [vmem:[%s925_s3 + $0x8] sm:$0xff] %vm104_vm1, %v241_v27  ;;  %378 = vst.msk [vmem:[%s925_s3 + $0xa8] sm:$0xff] %vm104_vm1, %v301_v28  ;;  %v245_v31 = vadd.f32 %v244_v29, %v739_v19  ;;  %v305_v32 = vadd.f32 %v304_v30, %v739_v19 }
  0xef   :  { %v246_v33 = vpop.f32.mrf.mxu0  ;;  %v306_v34 = vpop.f32.mrf.mxu1 }
  0xf0   :  { %359 = vst [vmem:[%s925_s3 + $0x10] sm:$0xff] %v245_v31  ;;  %379 = vst [vmem:[%s925_s3 + $0xb0] sm:$0xff] %v305_v32  ;;  %v247_v35 = vadd.f32 %v246_v33, %v741_v20  ;;  %v307_v36 = vadd.f32 %v306_v34, %v741_v20 }
  0xf1   :  { %v250_v37 = vpop.f32.mrf.mxu0  ;;  %v310_v38 = vpop.f32.mrf.mxu1 }
  0xf2   :  { %360 = vst.msk [vmem:[%s925_s3 + $0x18] sm:$0xff] %vm104_vm1, %v247_v35  ;;  %380 = vst.msk [vmem:[%s925_s3 + $0xb8] sm:$0xff] %vm104_vm1, %v307_v36  ;;  %v251_v39 = vadd.f32 %v250_v37, %v739_v19  ;;  %v311_v40 = vadd.f32 %v310_v38, %v739_v19 }
  0xf3   :  { %v252_v41 = vpop.f32.mrf.mxu0  ;;  %v312_v42 = vpop.f32.mrf.mxu1 }
  0xf4   :  { %361 = vst [vmem:[%s925_s3 + $0x20] sm:$0xff] %v251_v39  ;;  %381 = vst [vmem:[%s925_s3 + $0xc0] sm:$0xff] %v311_v40  ;;  %v253_v43 = vadd.f32 %v252_v41, %v741_v20  ;;  %v313_v44 = vadd.f32 %v312_v42, %v741_v20 }
  0xf5   :  { %v256_v45 = vpop.f32.mrf.mxu0  ;;  %v316_v46 = vpop.f32.mrf.mxu1 }
  0xf6   :  { %362 = vst.msk [vmem:[%s925_s3 + $0x28] sm:$0xff] %vm104_vm1, %v253_v43  ;;  %382 = vst.msk [vmem:[%s925_s3 + $0xc8] sm:$0xff] %vm104_vm1, %v313_v44  ;;  %v257_v47 = vadd.f32 %v256_v45, %v739_v19  ;;  %v317_v48 = vadd.f32 %v316_v46, %v739_v19 }
  0xf7   :  { %v258_v49 = vpop.f32.mrf.mxu0  ;;  %v318_v50 = vpop.f32.mrf.mxu1 }
  0xf8   :  { %363 = vst [vmem:[%s925_s3 + $0x30] sm:$0xff] %v257_v47  ;;  %383 = vst [vmem:[%s925_s3 + $0xd0] sm:$0xff] %v317_v48  ;;  %v259_v51 = vadd.f32 %v258_v49, %v741_v20  ;;  %v319_v52 = vadd.f32 %v318_v50, %v741_v20 }
  0xf9   :  { %v262_v53 = vpop.f32.mrf.mxu0  ;;  %v322_v54 = vpop.f32.mrf.mxu1 }
  0xfa   :  { %364 = vst.msk [vmem:[%s925_s3 + $0x38] sm:$0xff] %vm104_vm1, %v259_v51  ;;  %384 = vst.msk [vmem:[%s925_s3 + $0xd8] sm:$0xff] %vm104_vm1, %v319_v52  ;;  %v263_v55 = vadd.f32 %v262_v53, %v739_v19  ;;  %v323_v56 = vadd.f32 %v322_v54, %v739_v19 }
  0xfb   :  { %v264_v57 = vpop.f32.mrf.mxu0  ;;  %v324_v58 = vpop.f32.mrf.mxu1 }
  0xfc   :  { %365 = vst [vmem:[%s925_s3 + $0x40] sm:$0xff] %v263_v55  ;;  %385 = vst [vmem:[%s925_s3 + $0xe0] sm:$0xff] %v323_v56  ;;  %v265_v59 = vadd.f32 %v264_v57, %v741_v20  ;;  %v325_v60 = vadd.f32 %v324_v58, %v741_v20 }
  0xfd   :  { %v268_v61 = vpop.f32.mrf.mxu0  ;;  %v328_v62 = vpop.f32.mrf.mxu1 }
  0xfe   :  { %366 = vst.msk [vmem:[%s925_s3 + $0x48] sm:$0xff] %vm104_vm1, %v265_v59  ;;  %386 = vst.msk [vmem:[%s925_s3 + $0xe8] sm:$0xff] %vm104_vm1, %v325_v60  ;;  %v269_v63 = vadd.f32 %v268_v61, %v739_v19  ;;  %v329_v0 = vadd.f32 %v328_v62, %v739_v19 }
  0xff   :  { %v270_v1 = vpop.f32.mrf.mxu0  ;;  %v330_v2 = vpop.f32.mrf.mxu1 }
 0x100   :  { %367 = vst [vmem:[%s925_s3 + $0x50] sm:$0xff] %v269_v63  ;;  %387 = vst [vmem:[%s925_s3 + $0xf0] sm:$0xff] %v329_v0  ;;  %v271_v3 = vadd.f32 %v270_v1, %v741_v20  ;;  %v331_v4 = vadd.f32 %v330_v2, %v741_v20 }
 0x101   :  { %v274_v5 = vpop.f32.mrf.mxu0  ;;  %v334_v6 = vpop.f32.mrf.mxu1 }
 0x102   :  { %368 = vst.msk [vmem:[%s925_s3 + $0x58] sm:$0xff] %vm104_vm1, %v271_v3  ;;  %388 = vst.msk [vmem:[%s925_s3 + $0xf8] sm:$0xff] %vm104_vm1, %v331_v4  ;;  %v275_v7 = vadd.f32 %v274_v5, %v739_v19  ;;  %v335_v8 = vadd.f32 %v334_v6, %v739_v19 }
 0x103   :  { %v276_v9 = vpop.f32.mrf.mxu0  ;;  %v336_v10 = vpop.f32.mrf.mxu1 }
 0x104   :  { %369 = vst [vmem:[%s925_s3 + $0x60] sm:$0xff] %v275_v7  ;;  %389 = vst [vmem:[%s925_s3 + $0x100] sm:$0xff] %v335_v8  ;;  %v277_v11 = vadd.f32 %v276_v9, %v741_v20  ;;  %v337_v12 = vadd.f32 %v336_v10, %v741_v20 }
 0x105   :  { %v280_v13 = vpop.f32.mrf.mxu0  ;;  %v340_v14 = vpop.f32.mrf.mxu1 }
 0x106   :  { %370 = vst.msk [vmem:[%s925_s3 + $0x68] sm:$0xff] %vm104_vm1, %v277_v11  ;;  %390 = vst.msk [vmem:[%s925_s3 + $0x108] sm:$0xff] %vm104_vm1, %v337_v12  ;;  %v281_v15 = vadd.f32 %v280_v13, %v739_v19  ;;  %v341_v16 = vadd.f32 %v340_v14, %v739_v19 }
 0x107   :  { %v282_v17 = vpop.f32.mrf.mxu0  ;;  %v342_v18 = vpop.f32.mrf.mxu1 }
 0x108   :  { %371 = vst [vmem:[%s925_s3 + $0x70] sm:$0xff] %v281_v15  ;;  %391 = vst [vmem:[%s925_s3 + $0x110] sm:$0xff] %v341_v16  ;;  %v283_v21 = vadd.f32 %v282_v17, %v741_v20  ;;  %v343_v22 = vadd.f32 %v342_v18, %v741_v20 }
 0x109   :  { %v286_v23 = vpop.f32.mrf.mxu0  ;;  %v346_v24 = vpop.f32.mrf.mxu1 }
 0x10a   :  { %372 = vst.msk [vmem:[%s925_s3 + $0x78] sm:$0xff] %vm104_vm1, %v283_v21  ;;  %392 = vst.msk [vmem:[%s925_s3 + $0x118] sm:$0xff] %vm104_vm1, %v343_v22  ;;  %v287_v25 = vadd.f32 %v286_v23, %v739_v19  ;;  %v347_v26 = vadd.f32 %v346_v24, %v739_v19 }
 0x10b   :  { %v288_v27 = vpop.f32.mrf.mxu0  ;;  %v348_v28 = vpop.f32.mrf.mxu1 }
 0x10c   :  { %373 = vst [vmem:[%s925_s3 + $0x80] sm:$0xff] %v287_v25  ;;  %393 = vst [vmem:[%s925_s3 + $0x120] sm:$0xff] %v347_v26  ;;  %v289_v29 = vadd.f32 %v288_v27, %v741_v20  ;;  %v349_v30 = vadd.f32 %v348_v28, %v741_v20 }
 0x10d   :  { %v292_v31 = vpop.f32.mrf.mxu0  ;;  %v352_v32 = vpop.f32.mrf.mxu1 }
 0x10e   :  { %374 = vst.msk [vmem:[%s925_s3 + $0x88] sm:$0xff] %vm104_vm1, %v289_v29  ;;  %394 = vst.msk [vmem:[%s925_s3 + $0x128] sm:$0xff] %vm104_vm1, %v349_v30  ;;  %v293_v33 = vadd.f32 %v292_v31, %v739_v19  ;;  %v353_v34 = vadd.f32 %v352_v32, %v739_v19 }
 0x10f   :  { %v294_v35 = vpop.f32.mrf.mxu0  ;;  %v354_v36 = vpop.f32.mrf.mxu1 }
 0x110   :  { %375 = vst [vmem:[%s925_s3 + $0x90] sm:$0xff] %v293_v33  ;;  %395 = vst [vmem:[%s925_s3 + $0x130] sm:$0x3f] %v353_v34  ;;  %v295_v37 = vadd.f32 %v294_v35, %v741_v20  ;;  %v355_v38 = vadd.f32 %v354_v36, %v741_v20 }
 0x112   :  { %376 = vst.msk [vmem:[%s925_s3 + $0x98] sm:$0xff] %vm104_vm1, %v295_v37 }
 0x113   :  { %397 = vst.msk [vmem:[%s925_s3 + $0x138] sm:$0x3f] %vm396_vm2, %v355_v38 }

</bundles_post_ra>
